<compile_context>
chip_gen: v6e
topology: v6e:2x2x1
jax: 0.10.0
libtpu: 0.0.40
codegen_flags: <defaults>
</compile_context>

<pallas_src>
import jax
import jax.numpy as jnp
from jax import lax
from jax.experimental import pallas as pl
from jax.experimental.pallas import tpu as pltpu


# Scoped VMEM budget. Per-step working sets are kept well below this by the
# batch-tile picker; 48 MiB leaves headroom under v7x's 64 MiB/TC physical
# VMEM while allowing larger tiles on v5e/v6e (128 MiB).
_VMEM_LIMIT = 48 * 1024 * 1024
# Per-grid-step working-set budget used when picking the batch tile
# (conservative: double-buffered inputs/outputs + scratch + matmul temps).
_TILE_BUDGET = 12 * 1024 * 1024


def _compiler_params():
    return pltpu.CompilerParams(dimension_semantics=("parallel",),
                                vmem_limit_bytes=_VMEM_LIMIT)


def _pick_batch_tile(n, per_sample_bytes, budget_bytes=_TILE_BUDGET):
    """Largest divisor of n whose working set fits the budget, keeping the
    grid length >= 2 (when n >= 2) so both v7x TensorCores get work."""
    best = 1
    for bt in range(1, n + 1):
        if n % bt:
            continue
        if bt * per_sample_bytes > budget_bytes:
            continue
        if n >= 2 and n // bt < 2:
            continue
        best = bt
    return best


# ----------------------------- in-kernel helpers ---------------------------


def _write_padded(pad_ref, a_cdt, h, w):
    """Zero only the 1-wide border of the (B, H+2, W+2, C) scratch and write
    the activation (already cast to the scratch dtype) into the interior.

    The interior is fully overwritten every grid step, so the full-scratch
    re-zero is unnecessary; a pl.when(program_id==0)-gated zero would be
    unsafe because megacore sharding means not every core sees step 0.
    """
    b, hp, wp, c = pad_ref.shape
    zrow = jnp.zeros((b, 1, wp, c), pad_ref.dtype)
    zcol = jnp.zeros((b, hp, 1, c), pad_ref.dtype)
    pad_ref[:, 0:1, :, :] = zrow
    pad_ref[:, hp - 1:hp, :, :] = zrow
    pad_ref[:, :, 0:1, :] = zcol
    pad_ref[:, :, wp - 1:wp, :] = zcol
    pad_ref[:, 1:h + 1, 1:w + 1, :] = a_cdt


def _conv3x3_patches(pad_ref, h, w, stride):
    """Read the nine (ky, kx) taps of a 3x3/pad-1 conv back out of the padded
    scratch (subsampled here when stride > 1, i.e. BEFORE the matmul) and
    concatenate them into a (B*Ho*Wo, 9*C) patch matrix in the scratch dtype."""
    b = pad_ref.shape[0]
    c = pad_ref.shape[-1]
    ho, wo = h // stride, w // stride
    taps = []
    for ky in range(3):
        for kx in range(3):
            if stride == 1:
                taps.append(pad_ref[:, ky:ky + h, kx:kx + w, :])
            else:
                taps.append(pad_ref[:, pl.ds(ky, ho, stride),
                                    pl.ds(kx, wo, stride), :])
    patches = jnp.concatenate(taps, axis=-1)                 # (B, Ho, Wo, 9*C)
    return patches.reshape(b * ho * wo, 9 * c)


def _mxu_sum_sumsq(xf):
    """Per-column [sum, sum-of-squares] of an (K, C) f32 matrix, reduced on the
    MXU (ones-row matmuls) instead of the XLU.  Returns (2, C) f32."""
    k = xf.shape[0]
    ones = jnp.ones((1, k), jnp.float32)
    s = jnp.dot(ones, xf, preferred_element_type=jnp.float32)
    ss = jnp.dot(ones, xf * xf, preferred_element_type=jnp.float32)
    return jnp.concatenate([s, ss], axis=0)


# --------------------------------- kernels ----------------------------------


def _make_stats_kernel(bt, h, w, c):
    """Pass 0: per-tile per-channel [sum, sumsq] of x (bn1 batch statistics)."""

    def kernel(x_ref, o_ref):
        x = x_ref[...].astype(jnp.float32)                   # (B, H, W, C)
        xf = x.reshape(bt * h * w, c)
        # NOTE: E[x^2] - E[x]^2 in f32 can cancel for large-mean/low-variance
        # channels; acceptable for training-mode BN on normalised activations.
        o_ref[...] = _mxu_sum_sumsq(xf).reshape(1, 2, c)

    return kernel


def _make_pass1_kernel(stride, has_sc_conv, bt, h, w, cin, planes):
    """Pass 1: relu(bn1(x)) -> [conv1(stride) | shortcut] in ONE MXU matmul,
    plus bn2 partial statistics."""
    ho, wo = h // stride, w // stride

    def kernel(x_ref, wbig_ref, aff1_ref, h1_ref, sc_ref, st2_ref, pad_ref):
        x = x_ref[...].astype(jnp.float32)                   # (B, H, W, Cin)

        # bn1 folded into a per-channel affine (scale/shift prepared on host)
        aff = aff1_ref[...]
        scale = aff[0:1, :].reshape(1, 1, 1, cin)
        shift = aff[1:2, :].reshape(1, 1, 1, cin)
        a = jnp.maximum(x * scale + shift, 0.0)              # relu(bn1(x)), f32

        # single cast into the compute-dtype padded scratch; taps read back
        # from it are already in compute dtype (no per-patch cast).
        _write_padded(pad_ref, a.astype(pad_ref.dtype), h, w)
        patches = _conv3x3_patches(pad_ref, h, w, stride)    # (B*Ho*Wo, 9*Cin)

        # one wide-K MXU matmul; when a 1x1 shortcut conv exists its weight is
        # embedded in the centre-tap rows of the widened RHS so this single
        # matmul yields [h1 | shortcut].
        hs = jnp.dot(patches, wbig_ref[...],
                     preferred_element_type=jnp.float32)     # (B*Ho*Wo, P or 2P)
        h1 = hs[:, :planes]
        # TODO(synk): Dropout2d with p > 0 (training) needs in-kernel RNG
        # (pltpu.prng_seed / pltpu.prng_random_bits) with a per-(sample,
        # channel) mask; dropout_rate == 0.0 -> identity.
        if has_sc_conv:
            sc = hs[:, planes:2 * planes]
        else:
            sc = a.reshape(bt * ho * wo, cin)                # identity (Cin==P, stride==1)

        # bn2 partial statistics from the f32 h1 (before the bf16 store), on
        # the MXU.
        st2_ref[...] = _mxu_sum_sumsq(h1).reshape(1, 2, planes)

        # lane-dense (Ho, Wo*P) inter-pass layout, stored in compute dtype
        # (bf16 by default -> half the HBM traffic to pass 2).
        h1_ref[...] = h1.reshape(bt, ho, wo * planes).astype(h1_ref.dtype)
        sc_ref[...] = sc.reshape(bt, ho, wo * planes).astype(sc_ref.dtype)

    return kernel


def _make_pass2_kernel(bt, ho, wo, planes):
    """Pass 2: out = conv2(relu(bn2(h1))) + shortcut."""

    def kernel(h1_ref, sc_ref, w2_ref, aff2_ref, out_ref, pad_ref):
        h1 = h1_ref[...].astype(jnp.float32).reshape(bt, ho, wo, planes)
        aff = aff2_ref[...]
        scale = aff[0:1, :].reshape(1, 1, 1, planes)
        shift = aff[1:2, :].reshape(1, 1, 1, planes)
        a2 = jnp.maximum(h1 * scale + shift, 0.0)            # relu(bn2(h1))

        _write_padded(pad_ref, a2.astype(pad_ref.dtype), ho, wo)
        patches = _conv3x3_patches(pad_ref, ho, wo, 1)       # (B*Ho*Wo, 9*P)
        h2 = jnp.dot(patches, w2_ref[...],
                     preferred_element_type=jnp.float32)     # (B*Ho*Wo, P)

        # residual add + lane-dense store
        out = h2.reshape(bt, ho, wo * planes) + sc_ref[...].astype(jnp.float32)
        out_ref[...] = out.astype(out_ref.dtype)

    return kernel


# ------------------------------ host wrapper -------------------------------


def weight_norm_w(v, g):
    """PyTorch weight_norm (dim=0): w = g * v / ||v||, norm over (in, kh, kw)."""
    norm = jnp.sqrt(jnp.sum(v * v, axis=(1, 2, 3), keepdims=True))
    return v * (g.reshape(-1, 1, 1, 1) / norm)


def _wn_matmul_weight(v, g, dtype):
    """OIHW weight-normed conv weight -> matmul-ready (kh*kw*Cin, Cout)."""
    w = weight_norm_w(v, g)                                  # (Cout, Cin, kh, kw)
    w = jnp.transpose(w, (2, 3, 1, 0))                       # HWIO
    kh, kw, cin, cout = w.shape
    return w.reshape(kh * kw * cin, cout).astype(dtype)


def _build_pass1_weight(params, in_planes, planes, has_sc_conv, cdt):
    """Weight-normed conv1 RHS (9*Cin, P).  When the 1x1 weight-normed shortcut
    conv exists, widen to (9*Cin, 2P) with the shortcut weight embedded in the
    centre-tap rows (tap index 4 = (ky=1, kx=1)) so one MXU matmul yields
    [h1 | shortcut]."""
    w1 = _wn_matmul_weight(params["v1"], params["g1w"], jnp.float32)   # (9*Cin, P)
    if not has_sc_conv:
        return w1.astype(cdt)
    wsc = weight_norm_w(params["vsc"], params["gscw"])                  # (P, Cin, 1, 1)
    wsc = jnp.transpose(wsc, (2, 3, 1, 0)).reshape(in_planes, planes)   # (Cin, P)
    sc_cols = jnp.zeros((9 * in_planes, planes), jnp.float32)
    sc_cols = sc_cols.at[4 * in_planes:5 * in_planes, :].set(wsc)
    return jnp.concatenate([w1, sc_cols], axis=1).astype(cdt)           # (9*Cin, 2P)


def _finalize_bn(partials, count, gamma, beta, eps):
    """(G, 2, C) per-tile [sum, sumsq] -> folded (2, C) [scale, shift]."""
    tot = jnp.sum(partials.astype(jnp.float32), axis=0)      # (2, C)
    mean = tot[0] / count
    var = tot[1] / count - mean * mean                       # biased (training mode)
    scale = gamma * lax.rsqrt(var + eps)
    shift = beta - mean * scale
    return jnp.stack([scale, shift], axis=0)                 # (2, C)


def preact_block_wndrop(x_nchw, params, *, stride=1, dropout_rate=0.0,
                        eps=1e-5, compute_dtype=jnp.bfloat16, batch_tile=None):
    """Forward pass. x_nchw: (N, Cin, H, W) f32 -> (N, planes, H/s, W/s)."""
    if dropout_rate != 0.0:
        # TODO(synk): Dropout2d with p > 0 needs per-(sample, channel) random
        # masks via in-kernel RNG (pltpu.prng_seed / pltpu.prng_random_bits).
        raise NotImplementedError("dropout_rate > 0 is not implemented")

    in_planes = x_nchw.shape[1]
    planes = params["v1"].shape[0]
    has_sc_conv = (stride != 1) or (in_planes != planes)
    cdt = compute_dtype
    csz = jnp.dtype(cdt).itemsize

    # NOTE: when stacking several blocks, keep the internal lane-dense NHWC /
    # (N, Ho, Wo*P) layout as the inter-block interface and drop these
    # NCHW<->NHWC transposes except at model boundaries (each one is a full
    # HBM read+write done by XLA outside the kernel).
    x = jnp.transpose(x_nchw, (0, 2, 3, 1)).astype(jnp.float32)   # NHWC
    N, H, W, _ = x.shape
    if H % stride or W % stride:
        # TODO(synk): odd spatial dims need PyTorch's (H+1)//2 output size.
        raise NotImplementedError("H and W must be divisible by stride")
    Ho, Wo = H // stride, W // stride

    # batch tile: amortise per-grid-step overhead and enlarge the matmul M dim
    # while keeping the per-step working set within a conservative VMEM budget.
    if batch_tile is None:
        per_sample = (2 * H * W * in_planes * 4                      # x (dbl-buffered)
                      + (H + 2) * (W + 2) * in_planes * csz          # pad scratch
                      + Ho * Wo * 9 * in_planes * csz                # patch matrix
                      + Ho * Wo * 2 * planes * 4                     # matmul result
                      + 4 * Ho * Wo * planes * csz)                  # h1/sc (dbl-buffered)
        batch_tile = _pick_batch_tile(N, per_sample)
    bt = batch_tile
    assert N % bt == 0, (N, bt)
    G = N // bt
    cp = _compiler_params()

    # host-side parameter glue: weight-norm + matmul-ready reshape, in cdt
    wbig = _build_pass1_weight(params, in_planes, planes, has_sc_conv, cdt)
    out_cols = wbig.shape[1]                                          # P or 2P
    w2m = _wn_matmul_weight(params["v2"], params["g2w"], cdt)         # (9*P, P)

    # ---- pass 0: bn1 batch statistics (per-tile partials, tiny host reduce)
    st1 = pl.pallas_call(
        _make_stats_kernel(bt, H, W, in_planes),
        out_shape=jax.ShapeDtypeStruct((G, 2, in_planes), jnp.float32),
        grid=(G,),
        in_specs=[pl.BlockSpec((bt, H, W, in_planes), lambda g: (g, 0, 0, 0))],
        out_specs=pl.BlockSpec((1, 2, in_planes), lambda g: (g, 0, 0)),
        compiler_params=cp,
        cost_estimate=pl.CostEstimate(
            flops=4 * N * H * W * in_planes,
            transcendentals=0,
            bytes_accessed=N * H * W * in_planes * 4 + G * 2 * in_planes * 4),
    )(x)
    aff1 = _finalize_bn(st1, N * H * W,
                        params["bn1_gamma"], params["bn1_beta"], eps)

    # ---- pass 1: relu(bn1) -> [conv1(stride) | shortcut] + bn2 partial stats
    h1, sc, st2 = pl.pallas_call(
        _make_pass1_kernel(stride, has_sc_conv, bt, H, W, in_planes, planes),
        out_shape=(jax.ShapeDtypeStruct((N, Ho, Wo * planes), cdt),
                   jax.ShapeDtypeStruct((N, Ho, Wo * planes), cdt),
                   jax.ShapeDtypeStruct((G, 2, planes), jnp.float32)),
        grid=(G,),
        in_specs=[pl.BlockSpec((bt, H, W, in_planes), lambda g: (g, 0, 0, 0)),
                  pl.BlockSpec((9 * in_planes, out_cols), lambda g: (0, 0)),
                  pl.BlockSpec((2, in_planes), lambda g: (0, 0))],
        out_specs=(pl.BlockSpec((bt, Ho, Wo * planes), lambda g: (g, 0, 0)),
                   pl.BlockSpec((bt, Ho, Wo * planes), lambda g: (g, 0, 0)),
                   pl.BlockSpec((1, 2, planes), lambda g: (g, 0, 0))),
        scratch_shapes=[pltpu.VMEM((bt, H + 2, W + 2, in_planes), cdt)],
        compiler_params=cp,
        cost_estimate=pl.CostEstimate(
            flops=2 * N * Ho * Wo * 9 * in_planes * out_cols
                  + 4 * N * Ho * Wo * planes,
            transcendentals=0,
            bytes_accessed=N * H * W * in_planes * 4
                           + 2 * N * Ho * Wo * planes * csz
                           + 9 * in_planes * out_cols * csz),
    )(x, wbig, aff1)
    aff2 = _finalize_bn(st2, N * Ho * Wo,
                        params["bn2_gamma"], params["bn2_beta"], eps)

    # ---- pass 2: conv2(relu(bn2(h1))) + shortcut
    out2d = pl.pallas_call(
        _make_pass2_kernel(bt, Ho, Wo, planes),
        out_shape=jax.ShapeDtypeStruct((N, Ho, Wo * planes), jnp.float32),
        grid=(G,),
        in_specs=[pl.BlockSpec((bt, Ho, Wo * planes), lambda g: (g, 0, 0)),
                  pl.BlockSpec((bt, Ho, Wo * planes), lambda g: (g, 0, 0)),
                  pl.BlockSpec((9 * planes, planes), lambda g: (0, 0)),
                  pl.BlockSpec((2, planes), lambda g: (0, 0))],
        out_specs=pl.BlockSpec((bt, Ho, Wo * planes), lambda g: (g, 0, 0)),
        scratch_shapes=[pltpu.VMEM((bt, Ho + 2, Wo + 2, planes), cdt)],
        compiler_params=cp,
        cost_estimate=pl.CostEstimate(
            flops=2 * N * Ho * Wo * 9 * planes * planes,
            transcendentals=0,
            bytes_accessed=2 * N * Ho * Wo * planes * csz
                           + N * Ho * Wo * planes * 4
                           + 9 * planes * planes * csz),
    )(h1, sc, w2m, aff2)

    out = out2d.reshape(N, Ho, Wo, planes)                    # lane-dense -> NHWC
    return jnp.transpose(out, (0, 3, 1, 2))                   # -> NCHW


# ------------------------- plain-JAX reference ------------------------------


def reference_forward(x_nchw, params, *, stride=1, eps=1e-5):
    x = jnp.transpose(x_nchw, (0, 2, 3, 1)).astype(jnp.float32)
    in_planes = x.shape[-1]
    planes = params["v1"].shape[0]
    has_sc_conv = (stride != 1) or (in_planes != planes)
    dn = ("NHWC", "HWIO", "NHWC")

    def bn(h, g, b):
        m = jnp.mean(h, axis=(0, 1, 2), keepdims=True)
        v = jnp.mean(jnp.square(h - m), axis=(0, 1, 2), keepdims=True)
        return (h - m) / jnp.sqrt(v + eps) * g.reshape(1, 1, 1, -1) + b.reshape(1, 1, 1, -1)

    w1 = jnp.transpose(weight_norm_w(params["v1"], params["g1w"]), (2, 3, 1, 0))
    w2 = jnp.transpose(weight_norm_w(params["v2"], params["g2w"]), (2, 3, 1, 0))

    a = jax.nn.relu(bn(x, params["bn1_gamma"], params["bn1_beta"]))
    if has_sc_conv:
        wsc = jnp.transpose(weight_norm_w(params["vsc"], params["gscw"]), (2, 3, 1, 0))
        sc = lax.conv_general_dilated(a, wsc, (stride, stride), "VALID",
                                      dimension_numbers=dn)
    else:
        sc = a
    h = lax.conv_general_dilated(a, w1, (stride, stride), [(1, 1), (1, 1)],
                                 dimension_numbers=dn)
    h = jax.nn.relu(bn(h, params["bn2_gamma"], params["bn2_beta"]))
    h = lax.conv_general_dilated(h, w2, (1, 1), [(1, 1), (1, 1)],
                                 dimension_numbers=dn)
    return jnp.transpose(h + sc, (0, 3, 1, 2))


# ---------------------------------- main ------------------------------------


if __name__ == "__main__":
    key = jax.random.PRNGKey(0)

    def make_params(k, in_planes, planes):
        ks = jax.random.split(k, 10)
        return {
            "v1": jax.random.normal(ks[0], (planes, in_planes, 3, 3), jnp.float32) * 0.2,
            "g1w": jax.random.uniform(ks[1], (planes,), minval=0.5, maxval=1.5),
            "v2": jax.random.normal(ks[2], (planes, planes, 3, 3), jnp.float32) * 0.2,
            "g2w": jax.random.uniform(ks[3], (planes,), minval=0.5, maxval=1.5),
            "vsc": jax.random.normal(ks[4], (planes, in_planes, 1, 1), jnp.float32) * 0.2,
            "gscw": jax.random.uniform(ks[5], (planes,), minval=0.5, maxval=1.5),
            "bn1_gamma": jax.random.uniform(ks[6], (in_planes,), minval=0.5, maxval=1.5),
            "bn1_beta": jax.random.normal(ks[7], (in_planes,), jnp.float32) * 0.1,
            "bn2_gamma": jax.random.uniform(ks[8], (planes,), minval=0.5, maxval=1.5),
            "bn2_beta": jax.random.normal(ks[9], (planes,), jnp.float32) * 0.1,
        }

    kp1, kp2, kx1, kx2 = jax.random.split(key, 4)

    # Config A: in_planes != planes -> weight-normed 1x1 shortcut conv (fused
    # into the conv1 matmul).  N=4 so the batch-tile picker selects bt=2 and a
    # 2-step parallel grid (exercises the batched im2col path).
    in_planes, planes, stride = 4, 8, 1
    N, H, W = 4, 16, 16
    params_a = make_params(kp1, in_planes, planes)
    x_a = jax.random.normal(kx1, (N, in_planes, H, W), jnp.float32)
    ref_a = reference_forward(x_a, params_a, stride=stride)

    # f32 compute path: tight structural check against the pure-f32 reference.
    out_f32 = jax.block_until_ready(
        preact_block_wndrop(x_a, params_a, stride=stride, compute_dtype=jnp.float32))
    assert out_f32.shape == (N, planes, H // stride, W // stride), out_f32.shape
    err_f32 = float(jnp.max(jnp.abs(out_f32 - ref_a)))
    if err_f32 > 1e-3:
        raise AssertionError(f"f32 kernel vs reference mismatch (conv shortcut): {err_f32}")

    # bf16-MXU path (default): relative tolerance accounts for bf16 rounding of
    # matmul inputs and of the bf16 inter-pass h1/sc stores (f32 accumulation).
    out_bf16 = jax.block_until_ready(
        preact_block_wndrop(x_a, params_a, stride=stride, compute_dtype=jnp.bfloat16))
    rel_err = float(jnp.max(jnp.abs(out_bf16 - ref_a)) / (jnp.max(jnp.abs(ref_a)) + 1e-6))
    if rel_err > 0.1:
        raise AssertionError(f"bf16 kernel vs reference mismatch (conv shortcut): {rel_err}")

    # Config B: in_planes == planes, stride 1 -> identity shortcut path.
    params_b = make_params(kp2, 8, 8)
    x_b = jax.random.normal(kx2, (N, 8, H, W), jnp.float32)
    ref_b = reference_forward(x_b, params_b, stride=1)
    out_b = jax.block_until_ready(
        preact_block_wndrop(x_b, params_b, stride=1, compute_dtype=jnp.float32))
    err_b = float(jnp.max(jnp.abs(out_b - ref_b)))
    if err_b > 1e-3:
        raise AssertionError(f"f32 kernel vs reference mismatch (identity): {err_b}")

    print("KERNEL_OK")
</pallas_src>

<mosaic_0001>
module attributes {stable_mosaic.version = 11 : i64} {
  func.func @kernel(%arg0: i32, %arg1: memref<2x16x16x4xf32, #tpu.memory_space<vmem>>, %arg2: memref<1x2x4xf32, #tpu.memory_space<vmem>>) attributes {dimension_semantics = [#tpu.dimension_semantics<parallel>], iteration_bounds = array<i64: 2>, scalar_prefetch = 0 : i64, scratch_operands = 0 : i64, tpu.core_type = #tpu.core_type<tc>, window_params = [{transform_indices = @transform_0, window_bounds = array<i64: 2, 16, 16, 4>}, {transform_indices = @transform_1, window_bounds = array<i64: 1, 2, 4>}]} {
    %c0 = arith.constant 0 : index
    %c0_0 = arith.constant 0 : index
    %c0_1 = arith.constant 0 : index
    %c0_2 = arith.constant 0 : index
    %0 = vector.load %arg1[%c0, %c0_0, %c0_1, %c0_2] : memref<2x16x16x4xf32, #tpu.memory_space<vmem>>, vector<2x16x16x4xf32>
    %1 = vector.shape_cast %0 : vector<2x16x16x4xf32> to vector<512x4xf32>
    %cst = arith.constant 1.000000e+00 : f32
    %2 = vector.broadcast %cst : f32 to vector<1x512xf32>
    %cst_3 = arith.constant dense<0.000000e+00> : vector<1x4xf32>
    %3 = tpu.matmul %2, %1, %cst_3 {dimension_numbers = #tpu.dot_dimension_numbers<[1], [0], [0], [1], [0, 0, 1, 1], [], []>} : vector<1x512xf32>, vector<512x4xf32>, vector<1x4xf32> -> vector<1x4xf32>
    %4 = arith.mulf %1, %1 : vector<512x4xf32>
    %cst_4 = arith.constant dense<0.000000e+00> : vector<1x4xf32>
    %5 = tpu.matmul %2, %4, %cst_4 {dimension_numbers = #tpu.dot_dimension_numbers<[1], [0], [0], [1], [0, 0, 1, 1], [], []>} : vector<1x512xf32>, vector<512x4xf32>, vector<1x4xf32> -> vector<1x4xf32>
    %6 = tpu.concatenate %3, %5 in 0 : vector<1x4xf32>, vector<1x4xf32> -> vector<2x4xf32>
    %7 = vector.shape_cast %6 : vector<2x4xf32> to vector<1x2x4xf32>
    %c0_5 = arith.constant 0 : index
    %c0_6 = arith.constant 0 : index
    %c0_7 = arith.constant 0 : index
    %8 = vector.load %arg2[%c0_5, %c0_6, %c0_7] : memref<1x2x4xf32, #tpu.memory_space<vmem>>, vector<1x2x4xf32>
    tpu.vector_store %arg2[%c0_5, %c0_6, %c0_7], %7 {strides = array<i32>} : memref<1x2x4xf32, #tpu.memory_space<vmem>>, vector<1x2x4xf32>,
    return
  }
  func.func @transform_0(%arg0: i32) -> (i32, i32, i32, i32) {
    %c0_i32 = arith.constant 0 : i32
    %c0_i32_0 = arith.constant 0 : i32
    %c0_i32_1 = arith.constant 0 : i32
    %c0_i32_2 = arith.constant 0 : i32
    return %arg0, %c0_i32, %c0_i32_0, %c0_i32_1 : i32, i32, i32, i32
  }
  func.func @transform_1(%arg0: i32) -> (i32, i32, i32) {
    %c0_i32 = arith.constant 0 : i32
    %c0_i32_0 = arith.constant 0 : i32
    %c0_i32_1 = arith.constant 0 : i32
    return %arg0, %c0_i32, %c0_i32_0 : i32, i32, i32
  }
}

</mosaic_0001>

<bundles_post_ra>
// kernel: tpu_custom_call.1
= control target key start
LH: loop header
LB: loop body
LE: loop exit
PB: predicated region body
PF: predicated region fallthrough
CT: control target
= control target key end

     0   :  { %6 = vsyncpa [#allocation3], 0  ;;  %s1361_s0 = inlined_call_operand.vmem [shape: f32[4,16,16,4], index: 0, kind: input, shape index: {}]   ;;  %s1362_s1 = inlined_call_operand.hbm [shape: f32[2,2,4], index: 1, kind: output, shape index: {}]  }
   0x1   :  { %8 = vsyncpa [#allocation3 + $0x1], 0  ;;  %s875_s6 = smov 0   ;;  %s877_s7 = smov 0  }
   0x2   :  { %s879_s8 = smov 0   ;;  %s881_s9 = smov 0  }
   0x3 LB: > { %s896_s10 = sadd.s32 4294967295, %s861_s9   ;;  %s608_s11 = sadd.s32 4294967294, %s861_s9   ;;  %s861_s9 = sphi %s881_s9, %s1391_s9   ;;  %s857_s8 = sphi %s879_s8, %s1390_s8   ;;  %s853_s7 = sphi %s877_s7, %s1389_s7   ;;  %s849_s6 = sphi %s875_s6, %s1388_s6  }
   0x4   : > { %s900_s12 = sadd.s32 1, %s861_s9   ;;  %s47_s13 = sadd.s32 1, %s857_s8 }
   0x5   : > { %s44_s14 = ssub.s32 %s861_s9, %s900_s12  ;;  %p57_p0 = scmp.ne.s32.totalorder %s857_s8, %s853_s7 }
   0x6   : > { %p45_p1 = scmp.eq.s32.totalorder %s44_s14, 0  ;;  %p58_p2 = scmp.eq.s32.totalorder %s896_s10, 1 }
   0x7   : > { %p63_p3 = scmp.ne.s32.totalorder %s853_s7, %s849_s6  ;;  %p64_p4 = scmp.eq.s32.totalorder %s608_s11, 1 }
   0x8   : > { %s911_s15 = scalar_select %p45_p1, %s857_s8, %s47_s13  }
   0x9   : > { %p913_p5 = por %p58_p2, %p57_p0  ;;  %p917_p6 = por %p64_p4, %p63_p3 }
   0xa   : > { %p611_p7 = scmp.ge.s32.totalorder %s861_s9, 1  ;;  %p92_p8 = scmp.lt.s32.totalorder %s861_s9, 3 }
   0xc   : > { %p93_p9 = pnand %p611_p7, %p92_p8 }
   0xe   : > { %96 = sbr.rel (%p93_p9) target bundleno = 309 (0x135), region = 24 }
  0x13   : > { %s613_s18 = sshll.u32 %s896_s10, 1  ;;  %v1363_v0 = vmov 1.0   ;;  %s110_s23 = sand.u32 1, %s853_s7   ;;  %vm531_vm0 = vcmask 1040384   ;;  %vm533_vm1 = vcmask 25600  }
  0x14   : > { %p114_p10 = scmp.lt.s32.totalorder %s613_s18, 3  ;;  %248 = vmatprep.mubr.f32.mxu0 %v1363_v0  ;;  %318 = vmatprep.mubr.f32.mxu1 %v1363_v0  ;;  %s612_s24 = sshll.u32 %s110_s23, 1 }
  0x15   : > { %s617_s25 = sshll.u32 %s896_s10, 5  ;;  %s112_s26 = scalar_lea.vmem [#allocation2], %s612_s24 }
  0x16   : > { %s1393_s18 = smov (!%p114_p10, %s613_s18), 3  ;;  %s549_s27 = sshll.u32 %s112_s26, 4  ;;  %s550_s27 = int_to_ptr.vmem [resolvable:$true] %s549_s27 }
  0x17   : > { %s620_s19 = sshll.u32 %s1393_s18, 8  ;;  %s1326_s30 = scalar_lea.hbm %s1362_s1, %s617_s25 }
  0x18   : > { %s929_s22 = scalar_lea.vmem %s1361_s0, %s620_s19  ;;  %s536_s2 = scalar_lea.sflag [#allocation3], %s110_s23 }
  0x19   : > { %v932_v1 = vld [vmem:[%s929_s22 + $0xf8] sm:$0xff]  ;;  %v946_v5 = vld [vmem:[%s929_s22 + $0xf0] sm:$0xff]  ;;  %v960_v9 = vld [vmem:[%s929_s22 + $0xe8] sm:$0xff]  ;;  %s801_s3 = scalar_lea.vmem %s550_s27, 32  ;;  %s864_s4 = smov [#allocation2]  }
  0x1a   : > { %v935_v2 = vld [vmem:[%s929_s22 + $0x1f8] sm:$0xff]  ;;  %621 = vmatprep.subr.mxu0 %v932_v1  ;;  %v949_v6 = vld [vmem:[%s929_s22 + $0x1f0] sm:$0xff]  ;;  %v965_v10 = vld [vmem:[%s929_s22 + $0x1e8] sm:$0xff]  ;;  %p802_p11 = scmp.ne.s32.totalorder %s550_s27, %s801_s3  ;;  %s805_s5 = sshll.u32 %s864_s4, 4  ;;  %s806_s5 = int_to_ptr.vmem [resolvable:$false] %s805_s5 }
  0x1b   : > { %v938_v3 = vld [vmem:[%s929_s22 + $0x78] sm:$0xff]  ;;  %656 = vmatprep.subr.mxu1 %v935_v2  ;;  %v954_v7 = vld [vmem:[%s929_s22 + $0x70] sm:$0xff]  ;;  %v968_v11 = vld [vmem:[%s929_s22 + $0x68] sm:$0xff]  ;;  %s807_s10 = scalar_lea.vmem %s806_s5, 64  ;;  %p808_p0 = scmp.lt.s32.totalorder %s550_s27, %s806_s5 }
  0x1c   : > { %v943_v4 = vld [vmem:[%s929_s22 + $0x178] sm:$0xff]  ;;  %622 = vmatpush3.msra.mxu0 %v938_v3  ;;  %v957_v8 = vld [vmem:[%s929_s22 + $0x170] sm:$0xff]  ;;  %v971_v12 = vld [vmem:[%s929_s22 + $0x168] sm:$0xff]  ;;  %p803_p12 = pnand %p802_p11, %p913_p5  ;;  %p809_p1 = scmp.lt.s32.totalorder %s807_s10, %s801_s3 }
  0x1d   : > { %657 = vmatpush3.msra.mxu1 %v943_v4  ;;  %623 = vmatprep.subr.mxu0 %v946_v5  ;;  %v976_v13 = vld [vmem:[%s929_s22 + $0xe0] sm:$0xff]  ;;  %v992_v17 = vld [vmem:[%s929_s22 + $0xd8] sm:$0xff]  ;;  %v1008_v21 = vld [vmem:[%s929_s22 + $0xd0] sm:$0xff] }
  0x1e   : > { %658 = vmatprep.subr.mxu1 %v949_v6  ;;  %624 = vmatpush3.msra.mxu0 %v954_v7  ;;  %v979_v14 = vld [vmem:[%s929_s22 + $0x1e0] sm:$0xff]  ;;  %v995_v18 = vld [vmem:[%s929_s22 + $0x1d8] sm:$0xff]  ;;  %v1011_v22 = vld [vmem:[%s929_s22 + $0x1d0] sm:$0xff]  ;;  %p804_p13 = pneg %p803_p12  ;;  %p810_p2 = por %p809_p1, %p808_p0 }
  0x1f   : > { %659 = vmatpush3.msra.mxu1 %v957_v8  ;;  %625 = vmatprep.subr.mxu0 %v960_v9  ;;  %v984_v15 = vld [vmem:[%s929_s22 + $0x60] sm:$0xff]  ;;  %v1000_v19 = vld [vmem:[%s929_s22 + $0x58] sm:$0xff]  ;;  %v1016_v23 = vld [vmem:[%s929_s22 + $0x50] sm:$0xff] }
  0x20   : > { %660 = vmatprep.subr.mxu1 %v965_v10  ;;  %v987_v16 = vld [vmem:[%s929_s22 + $0x160] sm:$0xff]  ;;  %626 = vmatpush3.msra.mxu0 %v968_v11  ;;  %v1003_v20 = vld [vmem:[%s929_s22 + $0x158] sm:$0xff]  ;;  %v1019_v24 = vld [vmem:[%s929_s22 + $0x150] sm:$0xff]  ;;  %p811_p3 = pnand %p810_p2, %p804_p13 }
  0x21   : > { %661 = vmatpush3.msra.mxu1 %v971_v12  ;;  %627 = vmatprep.subr.mxu0 %v976_v13  ;;  %v1024_v25 = vld [vmem:[%s929_s22 + $0xc8] sm:$0xff]  ;;  %v1040_v29 = vld [vmem:[%s929_s22 + $0xc0] sm:$0xff]  ;;  %v1056_v33 = vld [vmem:[%s929_s22 + $0xb8] sm:$0xff] }
  0x22   : > { %662 = vmatprep.subr.mxu1 %v979_v14  ;;  %628 = vmatpush3.msra.mxu0 %v984_v15  ;;  %v1027_v26 = vld [vmem:[%s929_s22 + $0x1c8] sm:$0xff]  ;;  %v1043_v30 = vld [vmem:[%s929_s22 + $0x1c0] sm:$0xff]  ;;  %v1059_v34 = vld [vmem:[%s929_s22 + $0x1b8] sm:$0xff] }
  0x23   : > { %663 = vmatpush3.msra.mxu1 %v987_v16  ;;  %629 = vmatprep.subr.mxu0 %v992_v17  ;;  %v1032_v27 = vld [vmem:[%s929_s22 + $0x48] sm:$0xff]  ;;  %v1048_v31 = vld [vmem:[%s929_s22 + $0x40] sm:$0xff]  ;;  %v1064_v35 = vld [vmem:[%s929_s22 + $0x38] sm:$0xff] }
  0x24   : > { %664 = vmatprep.subr.mxu1 %v995_v18  ;;  %630 = vmatpush3.msra.mxu0 %v1000_v19  ;;  %v1035_v28 = vld [vmem:[%s929_s22 + $0x148] sm:$0xff]  ;;  %v1051_v32 = vld [vmem:[%s929_s22 + $0x140] sm:$0xff]  ;;  %v1067_v36 = vld [vmem:[%s929_s22 + $0x138] sm:$0xff] }
  0x25   : > { %665 = vmatpush3.msra.mxu1 %v1003_v20  ;;  %631 = vmatprep.subr.mxu0 %v1008_v21  ;;  %v1072_v37 = vld [vmem:[%s929_s22 + $0xb0] sm:$0xff]  ;;  %v1088_v41 = vld [vmem:[%s929_s22 + $0xa8] sm:$0xff]  ;;  %v1104_v45 = vld [vmem:[%s929_s22 + $0xa0] sm:$0xff] }
  0x26   : > { %666 = vmatprep.subr.mxu1 %v1011_v22  ;;  %632 = vmatpush3.msra.mxu0 %v1016_v23  ;;  %v1075_v38 = vld [vmem:[%s929_s22 + $0x1b0] sm:$0xff]  ;;  %v1091_v42 = vld [vmem:[%s929_s22 + $0x1a8] sm:$0xff]  ;;  %v1107_v46 = vld [vmem:[%s929_s22 + $0x1a0] sm:$0xff] }
  0x27   : > { %667 = vmatpush3.msra.mxu1 %v1019_v24  ;;  %633 = vmatprep.subr.mxu0 %v1024_v25  ;;  %v1080_v39 = vld [vmem:[%s929_s22 + $0x30] sm:$0xff]  ;;  %v1096_v43 = vld [vmem:[%s929_s22 + $0x28] sm:$0xff]  ;;  %v1112_v47 = vld [vmem:[%s929_s22 + $0x20] sm:$0xff] }
  0x28   : > { %668 = vmatprep.subr.mxu1 %v1027_v26  ;;  %634 = vmatpush3.msra.mxu0 %v1032_v27  ;;  %v1083_v40 = vld [vmem:[%s929_s22 + $0x130] sm:$0xff]  ;;  %v1099_v44 = vld [vmem:[%s929_s22 + $0x128] sm:$0xff]  ;;  %v1115_v48 = vld [vmem:[%s929_s22 + $0x120] sm:$0xff] }
  0x29   : > { %669 = vmatpush3.msra.mxu1 %v1035_v28  ;;  %635 = vmatprep.subr.mxu0 %v1040_v29  ;;  %v1120_v49 = vld [vmem:[%s929_s22 + $0x98] sm:$0xff]  ;;  %v1136_v53 = vld [vmem:[%s929_s22 + $0x90] sm:$0xff]  ;;  %v1152_v57 = vld [vmem:[%s929_s22 + $0x88] sm:$0xff] }
  0x2a   : > { %670 = vmatprep.subr.mxu1 %v1043_v30  ;;  %636 = vmatpush3.msra.mxu0 %v1048_v31  ;;  %v1123_v50 = vld [vmem:[%s929_s22 + $0x198] sm:$0xff]  ;;  %v1139_v54 = vld [vmem:[%s929_s22 + $0x190] sm:$0xff]  ;;  %v1155_v58 = vld [vmem:[%s929_s22 + $0x188] sm:$0xff] }
  0x2b   : > { %671 = vmatpush3.msra.mxu1 %v1051_v32  ;;  %637 = vmatprep.subr.mxu0 %v1056_v33  ;;  %v1128_v51 = vld [vmem:[%s929_s22 + $0x18] sm:$0xff]  ;;  %1374 = vst [vmem:[#allocation5_spill] sm:$0xff] %v1139_v54  ;;  %v1144_v55 = vld [vmem:[%s929_s22 + $0x10] sm:$0xff]  ;;  %1377 = vst [vmem:[#allocation8_spill] sm:$0xff] %v1155_v58 }
  0x2c   : > { %672 = vmatprep.subr.mxu1 %v1059_v34  ;;  %638 = vmatpush3.msra.mxu0 %v1064_v35  ;;  %v1131_v52 = vld [vmem:[%s929_s22 + $0x118] sm:$0xff]  ;;  %1375 = vst [vmem:[#allocation6_spill] sm:$0xff] %v1144_v55  ;;  %v1147_v56 = vld [vmem:[%s929_s22 + $0x110] sm:$0xff]  ;;  %v1160_v59 = vld [vmem:[%s929_s22 + $0x8] sm:$0xff] }
  0x2d   : > { %673 = vmatpush3.msra.mxu1 %v1067_v36  ;;  %639 = vmatprep.subr.mxu0 %v1072_v37  ;;  %1376 = vst [vmem:[#allocation7_spill] sm:$0xff] %v1147_v56  ;;  %v1163_v60 = vld [vmem:[%s929_s22 + $0x108] sm:$0xff]  ;;  %v1168_v61 = vld [vmem:[%s929_s22 + $0x80] sm:$0xff] }
  0x2e   : > { %674 = vmatprep.subr.mxu1 %v1075_v38  ;;  %640 = vmatpush3.msra.mxu0 %v1080_v39  ;;  %1378 = vst [vmem:[#allocation9_spill] sm:$0xff] %v1163_v60  ;;  %v1171_v62 = vld [vmem:[%s929_s22 + $0x180] sm:$0xff] }
  0x2f   : > { %675 = vmatpush3.msra.mxu1 %v1083_v40  ;;  %641 = vmatprep.subr.mxu0 %v1088_v41  ;;  %v1176_v63 = vld [vmem:[%s929_s22] sm:$0xff] }
  0x30   : > { %676 = vmatprep.subr.mxu1 %v1091_v42  ;;  %642 = vmatpush3.msra.mxu0 %v1096_v43  ;;  %v1179_v0 = vld [vmem:[%s929_s22 + $0x100] sm:$0xff] }
  0x31   : > { %677 = vmatpush3.msra.mxu1 %v1099_v44  ;;  %643 = vmatprep.subr.mxu0 %v1104_v45  ;;  %1379 = vst [vmem:[#allocation10_spill] sm:$0xff] %v1179_v0 }
  0x32   : > { %678 = vmatprep.subr.mxu1 %v1107_v46  ;;  %644 = vmatpush3.msra.mxu0 %v1112_v47 }
  0x33   : > { %679 = vmatpush3.msra.mxu1 %v1115_v48  ;;  %645 = vmatprep.subr.mxu0 %v1120_v49 }
  0x34   : > { %680 = vmatprep.subr.mxu1 %v1123_v50  ;;  %646 = vmatpush3.msra.mxu0 %v1128_v51 }
  0x35   : > { %681 = vmatpush3.msra.mxu1 %v1131_v52  ;;  %647 = vmatprep.subr.mxu0 %v1136_v53 }
  0x36   : > { %682 = vmatprep.subr.mxu1 %v1139_v54  ;;  %648 = vmatpush3.msra.mxu0 %v1144_v55  ;;  %v355_v54 = vmul.f32 %v932_v1, %v932_v1  ;;  %v387_v55 = vmul.f32 %v935_v2, %v935_v2  ;;  %v354_v1 = vmul.f32 %v946_v5, %v946_v5 }
  0x37   : > { %683 = vmatpush3.msra.mxu1 %v1147_v56  ;;  %649 = vmatprep.subr.mxu0 %v1152_v57  ;;  %v339_v56 = vmul.f32 %v938_v3, %v938_v3  ;;  %v386_v2 = vmul.f32 %v949_v6, %v949_v6  ;;  %v338_v3 = vmul.f32 %v954_v7, %v954_v7 }
  0x38   : > { %684 = vmatprep.subr.mxu1 %v1155_v58  ;;  %650 = vmatpush3.msra.mxu0 %v1160_v59  ;;  %v371_v58 = vmul.f32 %v943_v4, %v943_v4  ;;  %v370_v4 = vmul.f32 %v957_v8, %v957_v8  ;;  %v353_v5 = vmul.f32 %v960_v9, %v960_v9 }
  0x39   : > { %685 = vmatpush3.msra.mxu1 %v1163_v60  ;;  %651 = vmatprep.subr.mxu0 %v1168_v61  ;;  %v1380_v60 = vmov 1.0   ;;  %v385_v6 = vmul.f32 %v965_v10, %v965_v10  ;;  %v369_v7 = vmul.f32 %v971_v12, %v971_v12  ;;  %v352_v8 = vmul.f32 %v976_v13, %v976_v13 }
  0x3a   : > { %686 = vmatprep.subr.mxu1 %v1171_v62  ;;  %652 = vmatpush3.msra.mxu0 %v1176_v63  ;;  %v336_v9 = vmul.f32 %v984_v15, %v984_v15  ;;  %v368_v10 = vmul.f32 %v987_v16, %v987_v16  ;;  %v383_v12 = vmul.f32 %v995_v18, %v995_v18 }
  0x3b   : > { %687 = vmatpush3.msra.mxu1 %v1179_v0  ;;  %249 = vmatmul.mubr.f32.vlgmr.msra.gmra.mxu0 %v1380_v60  ;;  %v337_v0 = vmul.f32 %v968_v11, %v968_v11  ;;  %v351_v11 = vmul.f32 %v992_v17, %v992_v17  ;;  %v335_v13 = vmul.f32 %v1000_v19, %v1000_v19 }
  0x3c   : > { %319 = vmatmul.mubr.f32.vlgmr.msra.gmra.mxu1 %v1380_v60  ;;  %691 = vmatprep.subr.mxu0 %v355_v54  ;;  %v384_v60 = vmul.f32 %v979_v14, %v979_v14  ;;  %v367_v14 = vmul.f32 %v1003_v20, %v1003_v20  ;;  %v350_v15 = vmul.f32 %v1008_v21, %v1008_v21  ;;  %v1383_v54 = vld [vmem:[#allocation7_spill] sm:$0xff] }
  0x3d   : > { %726 = vmatprep.subr.mxu1 %v387_v55  ;;  %692 = vmatpush3.msra.mxu0 %v339_v56  ;;  %v382_v16 = vmul.f32 %v1011_v22, %v1011_v22  ;;  %v334_v17 = vmul.f32 %v1016_v23, %v1016_v23  ;;  %v366_v18 = vmul.f32 %v1019_v24, %v1019_v24 }
  0x3e   : > { %727 = vmatpush3.msra.mxu1 %v371_v58  ;;  %693 = vmatprep.subr.mxu0 %v354_v1  ;;  %v381_v19 = vmul.f32 %v1027_v26, %v1027_v26  ;;  %v333_v20 = vmul.f32 %v1032_v27, %v1032_v27  ;;  %v365_v21 = vmul.f32 %v1035_v28, %v1035_v28  ;;  %v1385_v58 = vld [vmem:[#allocation9_spill] sm:$0xff] }
  0x3f   : > { %728 = vmatprep.subr.mxu1 %v386_v2  ;;  %694 = vmatpush3.msra.mxu0 %v338_v3  ;;  %v348_v22 = vmul.f32 %v1040_v29, %v1040_v29  ;;  %v380_v23 = vmul.f32 %v1043_v30, %v1043_v30  ;;  %v332_v24 = vmul.f32 %v1048_v31, %v1048_v31  ;;  %v1386_v3 = vld [vmem:[#allocation10_spill] sm:$0xff] }
  0x40   : > { %729 = vmatpush3.msra.mxu1 %v370_v4  ;;  %695 = vmatprep.subr.mxu0 %v353_v5  ;;  %v347_v26 = vmul.f32 %v1056_v33, %v1056_v33  ;;  %v379_v27 = vmul.f32 %v1059_v34, %v1059_v34  ;;  %v331_v28 = vmul.f32 %v1064_v35, %v1064_v35 }
  0x41   : > { %730 = vmatprep.subr.mxu1 %v385_v6  ;;  %696 = vmatpush3.msra.mxu0 %v337_v0  ;;  %v349_v0 = vmul.f32 %v1024_v25, %v1024_v25  ;;  %v364_v25 = vmul.f32 %v1051_v32, %v1051_v32  ;;  %v363_v29 = vmul.f32 %v1067_v36, %v1067_v36 }
  0x42   : > { %731 = vmatpush3.msra.mxu1 %v369_v7  ;;  %697 = vmatprep.subr.mxu0 %v352_v8  ;;  %v346_v30 = vmul.f32 %v1072_v37, %v1072_v37  ;;  %v378_v31 = vmul.f32 %v1075_v38, %v1075_v38  ;;  %v330_v32 = vmul.f32 %v1080_v39, %v1080_v39 }
  0x43   : > { %732 = vmatprep.subr.mxu1 %v384_v60  ;;  %698 = vmatpush3.msra.mxu0 %v336_v9  ;;  %v362_v33 = vmul.f32 %v1083_v40, %v1083_v40  ;;  %v345_v34 = vmul.f32 %v1088_v41, %v1088_v41  ;;  %v377_v35 = vmul.f32 %v1091_v42, %v1091_v42 }
  0x44   : > { %733 = vmatpush3.msra.mxu1 %v368_v10  ;;  %699 = vmatprep.subr.mxu0 %v351_v11  ;;  %v329_v36 = vmul.f32 %v1096_v43, %v1096_v43  ;;  %v361_v37 = vmul.f32 %v1099_v44, %v1099_v44  ;;  %v344_v38 = vmul.f32 %v1104_v45, %v1104_v45 }
  0x45   : > { %734 = vmatprep.subr.mxu1 %v383_v12  ;;  %700 = vmatpush3.msra.mxu0 %v335_v13  ;;  %v376_v39 = vmul.f32 %v1107_v46, %v1107_v46  ;;  %v328_v40 = vmul.f32 %v1112_v47, %v1112_v47  ;;  %v360_v41 = vmul.f32 %v1115_v48, %v1115_v48  ;;  %v1381_v47 = vld [vmem:[#allocation5_spill] sm:$0xff] }
  0x46   : > { %735 = vmatpush3.msra.mxu1 %v367_v14  ;;  %701 = vmatprep.subr.mxu0 %v350_v15  ;;  %v343_v42 = vmul.f32 %v1120_v49, %v1120_v49  ;;  %v375_v43 = vmul.f32 %v1123_v50, %v1123_v50  ;;  %v327_v44 = vmul.f32 %v1128_v51, %v1128_v51  ;;  %v1382_v49 = vld [vmem:[#allocation6_spill] sm:$0xff] }
  0x47   : > { %736 = vmatprep.subr.mxu1 %v382_v16  ;;  %702 = vmatpush3.msra.mxu0 %v334_v17  ;;  %v359_v45 = vmul.f32 %v1131_v52, %v1131_v52  ;;  %v342_v46 = vmul.f32 %v1136_v53, %v1136_v53  ;;  %v374_v48 = vmul.f32 %v1381_v47, %v1381_v47  ;;  %v1384_v52 = vld [vmem:[#allocation8_spill] sm:$0xff] }
  0x48   : > { %737 = vmatpush3.msra.mxu1 %v366_v18  ;;  %703 = vmatprep.subr.mxu0 %v349_v0  ;;  %v326_v50 = vmul.f32 %v1382_v49, %v1382_v49  ;;  %v358_v55 = vmul.f32 %v1383_v54, %v1383_v54  ;;  %v341_v51 = vmul.f32 %v1152_v57, %v1152_v57 }
  0x49   : > { %738 = vmatprep.subr.mxu1 %v381_v19  ;;  %704 = vmatpush3.msra.mxu0 %v333_v20  ;;  %v373_v56 = vmul.f32 %v1384_v52, %v1384_v52  ;;  %v325_v53 = vmul.f32 %v1160_v59, %v1160_v59  ;;  %v357_v60 = vmul.f32 %v1385_v58, %v1385_v58 }
  0x4a   : > { %739 = vmatpush3.msra.mxu1 %v365_v21  ;;  %705 = vmatprep.subr.mxu0 %v348_v22  ;;  %v340_v1 = vmul.f32 %v1168_v61, %v1168_v61  ;;  %v372_v2 = vmul.f32 %v1171_v62, %v1171_v62  ;;  %v324_v57 = vmul.f32 %v1176_v63, %v1176_v63  ;;  %v1387_v61 = vmov 1.0  }
  0x4b   : > { %740 = vmatprep.subr.mxu1 %v380_v23  ;;  %706 = vmatpush3.msra.mxu0 %v332_v24  ;;  %v356_v59 = vmul.f32 %v1386_v3, %v1386_v3 }
  0x4c   : > { %741 = vmatpush3.msra.mxu1 %v364_v25  ;;  %707 = vmatprep.subr.mxu0 %v347_v26 }
  0x4d   : > { %742 = vmatprep.subr.mxu1 %v379_v27  ;;  %708 = vmatpush3.msra.mxu0 %v331_v28 }
  0x4e   : > { %743 = vmatpush3.msra.mxu1 %v363_v29  ;;  %709 = vmatprep.subr.mxu0 %v346_v30 }
  0x4f   : > { %744 = vmatprep.subr.mxu1 %v378_v31  ;;  %710 = vmatpush3.msra.mxu0 %v330_v32 }
  0x50   : > { %745 = vmatpush3.msra.mxu1 %v362_v33  ;;  %711 = vmatprep.subr.mxu0 %v345_v34 }
  0x51   : > { %746 = vmatprep.subr.mxu1 %v377_v35  ;;  %712 = vmatpush3.msra.mxu0 %v329_v36 }
  0x52   : > { %747 = vmatpush3.msra.mxu1 %v361_v37  ;;  %713 = vmatprep.subr.mxu0 %v344_v38 }
  0x53   : > { %748 = vmatprep.subr.mxu1 %v376_v39  ;;  %714 = vmatpush3.msra.mxu0 %v328_v40 }
  0x54   : > { %749 = vmatpush3.msra.mxu1 %v360_v41  ;;  %715 = vmatprep.subr.mxu0 %v343_v42 }
  0x55   : > { %750 = vmatprep.subr.mxu1 %v375_v43  ;;  %716 = vmatpush3.msra.mxu0 %v327_v44 }
  0x56   : > { %751 = vmatpush3.msra.mxu1 %v359_v45  ;;  %717 = vmatprep.subr.mxu0 %v342_v46 }
  0x57   : > { %752 = vmatprep.subr.mxu1 %v374_v48  ;;  %718 = vmatpush3.msra.mxu0 %v326_v50 }
  0x58   : > { %753 = vmatpush3.msra.mxu1 %v358_v55  ;;  %719 = vmatprep.subr.mxu0 %v341_v51 }
  0x59   : > { %754 = vmatprep.subr.mxu1 %v373_v56  ;;  %720 = vmatpush3.msra.mxu0 %v325_v53 }
  0x5a   : > { %755 = vmatpush3.msra.mxu1 %v357_v60  ;;  %721 = vmatprep.subr.mxu0 %v340_v1 }
  0x5b   : > { %756 = vmatprep.subr.mxu1 %v372_v2  ;;  %722 = vmatpush3.msra.mxu0 %v324_v57 }
  0x5c   : > { %452 = vmatprep.mubr.f32.mxu0 %v1387_v61  ;;  %757 = vmatpush3.msra.mxu1 %v356_v59 }
  0x5d   : > { %522 = vmatprep.mubr.f32.mxu1 %v1387_v61  ;;  %453 = vmatmul.mubr.f32.vlgmr.msra.gmra.mxu0 %v1387_v61 }
  0x5e   : > { %523 = vmatmul.mubr.f32.vlgmr.msra.gmra.mxu1 %v1387_v61 }
  0xfb   : > { %v653_v62 = vpop.f32.mrf.mxu0 }
  0xfc   : > { %v688_v63 = vpop.f32.mrf.mxu1 }
  0xfd   : > { %v654_v4 = vpop.f32.mrf.mxu0 }
  0xfe   : > { %v689_v5 = vpop.f32.mrf.mxu1  ;;  %v655_v10 = vadd.f32 %v654_v4, %v653_v62 }
  0xff   : > { %v690_v11 = vadd.f32 %v689_v5, %v688_v63 }
 0x101   : > { %v321_v15 = vadd.f32 %v690_v11, %v655_v10 }
 0x11d   : > { %v723_v6 = vpop.f32.mrf.mxu0 }
 0x11e   : > { %v758_v7 = vpop.f32.mrf.mxu1 }
 0x11f   : > { %v724_v8 = vpop.f32.mrf.mxu0 }
 0x120   : > { %v759_v9 = vpop.f32.mrf.mxu1  ;;  %v725_v12 = vadd.f32 %v724_v8, %v723_v6 }
 0x121   : > { %v760_v13 = vadd.f32 %v759_v9, %v758_v7 }
 0x123   : > { %v525_v14 = vadd.f32 %v760_v13, %v725_v12 }
 0x125   : > { %v529_v16 = vrot.slane %v525_v14, 7 }
 0x127   : > { %v532_v17 = vsel %vm531_vm0, %v321_v15, %v529_v16 }
 0x128   : > { %534 = vst.msk [vmem:[%s112_s26] sm:$0x3] %vm533_vm1, %v532_v17 }
 0x129   : > { %814 = shalt.err (!%p811_p3)
}
 0x12a   : > { %s815_s11 = scalar_lea.hbm %s1326_s30, 32  ;;  %s819_s18 = scalar_lea.hbm %s1362_s1, 64 }
 0x12b   : > { %p816_p4 = scmp.ne.s32.totalorder %s1326_s30, %s815_s11  ;;  %p820_p9 = scmp.lt.s32.totalorder %s1326_s30, %s1362_s1 }
 0x12c   : > { %p821_p10 = scmp.lt.s32.totalorder %s819_s18, %s815_s11 }
 0x12d   : > { %p817_p7 = pnand %p816_p4, %p913_p5 }
 0x12e   : > { %p822_p11 = por %p821_p10, %p820_p9 }
 0x12f   : > { %p818_p8 = pneg %p817_p7 }
 0x131   : > { %p823_p12 = pnand %p822_p11, %p818_p8 }
 0x133   : > { %826 = shalt.err (!%p823_p12)
}
 0x134   : > { %761 = dma.vmem_to_hbm [thread:$0]  (%p913_p5), %s550_s27, 32, %s1326_s30, %s536_s2  }
 0x135 PF: > { %p767_p13 = scmp.ge.s32.totalorder %s861_s9, 2  ;;  %s561_s21 = sand.u32 1, %s849_s6  }
 0x136   : > { %s562_s22 = scalar_lea.sflag [#allocation3], %s561_s21 }
 0x137   : > { %p764_p0 = pnand %p767_p13, %p917_p6 }
 0x139   : > { %p765_p1 = pneg %p764_p0 }
 0x13b   : > { %844 = dma.done.wait (%p765_p1), %s562_s22, 32  }
 0x13c   : > { %846 = vsyncadd (%p765_p1), %s562_s22, 4294967264  ;;  %p11_p2 = scmp.ge.s32.totalorder %s900_s12, 4   ;;  %s1388_s6 = smov %s853_s7 }
 0x13d   : > { %s1389_s7 = smov %s857_s8  ;;  %s1390_s8 = smov %s911_s15 }
 0x13e   : > { %s1391_s9 = smov %s900_s12  ;;  %13 = sbr.rel (!%p11_p2) target bundleno = 3 (0x3), region = 59 }
 0x143   :  { %567 = vsyncpa [#allocation3], 1 }
 0x144   :  { %569 = vsyncpa [#allocation3 + $0x1], 1 }

</bundles_post_ra>
